<compile_context>
chip_gen: v6e
topology: v6e:2x2x1
jax: 0.10.0
libtpu: 0.0.40
codegen_flags: <defaults>
</compile_context>

<pallas_src>
import functools

import jax
import jax.numpy as jnp
from jax.experimental import pallas as pl
from jax.experimental.pallas import tpu as pltpu

_LANE = 128     # lane width -> lane-dense output tiles
_SUBLANE = 8    # f32 sublane granularity for batch tiles


def _round_up(n, m):
    return ((n + m - 1) // m) * m


def _num_tensorcores():
    """TensorCores per Pallas device (2 on v7x, 1 on v5e/v6e). Defensive."""
    try:
        info = pltpu.get_tpu_info()
        for attr in ("num_cores", "core_count", "num_tensorcores",
                     "tensorcore_count", "cores_per_chip"):
            n = getattr(info, attr, None)
            if isinstance(n, int) and n > 0:
                return min(n, 2)
    except Exception:
        pass
    try:
        n = getattr(jax.devices()[0], "num_cores", None)
        if isinstance(n, int) and n > 0:
            return min(n, 2)
    except Exception:
        pass
    return 1


def agent_mlp_kernel(x_ref, w1_ref, b1_ref, w2_ref, b2_ref, o_ref):
    """One batch tile of: relu(x @ W1 + b1) @ W2 + b2 (f32 MXU accumulation)."""
    h = jnp.dot(x_ref[...], w1_ref[...], preferred_element_type=jnp.float32)
    h = jnp.maximum(h + b1_ref[...].astype(jnp.float32), 0.0)
    q = jnp.dot(h.astype(w2_ref.dtype), w2_ref[...],
                preferred_element_type=jnp.float32)
    o_ref[...] = (q + b2_ref[...].astype(jnp.float32)).astype(o_ref.dtype)


def agent_forward(x, w1, b1, w2, b2, *, max_block_b=8192):
    """Fused 2-layer MLP head (Linear -> ReLU -> Linear) in one pallas_call.

    Weights/biases are VMEM-resident across batch tiles (constant index_maps);
    x / q tiles stream.  Batch is padded to a multiple of 8 and split into the
    minimum number of balanced tiles (1 on v5e/v6e, >=2 on v7x megacore).
    The output is computed 128-lane dense and sliced back to action_size.
    """
    B, D = x.shape
    A = w2.shape[1]

    # Lane-dense output: zero-pad W2 / b2 out-dim to a multiple of 128 lanes.
    a_pad = max(_LANE, _round_up(A, _LANE))
    if a_pad != A:
        w2 = jnp.pad(w2, ((0, 0), (0, a_pad - A)))
        b2 = jnp.pad(b2, ((0, 0), (0, a_pad - A)))

    # Batch tiling: pad only to a sublane multiple, balanced tiles.
    b8 = _round_up(max(B, 1), _SUBLANE)
    ncores = _num_tensorcores()
    min_tiles = ncores if b8 >= _SUBLANE * ncores else 1
    grid_n = max(min_tiles, pl.cdiv(b8, max_block_b))
    tb = _round_up(pl.cdiv(b8, grid_n), _SUBLANE)
    grid_n = pl.cdiv(b8, tb)
    b_pad = tb * grid_n
    if b_pad != B:
        x = jnp.pad(x, ((0, b_pad - B), (0, 0)))

    bytes_el = jnp.dtype(x.dtype).itemsize
    cost = pl.CostEstimate(
        flops=2 * b_pad * (D * D + D * a_pad),
        transcendentals=0,
        bytes_accessed=bytes_el * (b_pad * D + D * D + D + D * a_pad + a_pad
                                   + b_pad * a_pad),
    )

    out = pl.pallas_call(
        agent_mlp_kernel,
        out_shape=jax.ShapeDtypeStruct((b_pad, a_pad), x.dtype),
        grid_spec=pltpu.PrefetchScalarGridSpec(
            num_scalar_prefetch=0,
            grid=(grid_n,),
            in_specs=[
                pl.BlockSpec((tb, D), lambda i: (i, 0)),      # x: streams
                pl.BlockSpec((D, D), lambda i: (0, 0)),       # w1: resident
                pl.BlockSpec((1, D), lambda i: (0, 0)),       # b1: resident
                pl.BlockSpec((D, a_pad), lambda i: (0, 0)),   # w2: resident
                pl.BlockSpec((1, a_pad), lambda i: (0, 0)),   # b2: resident
            ],
            out_specs=pl.BlockSpec((tb, a_pad), lambda i: (i, 0)),
        ),
        compiler_params=pltpu.CompilerParams(
            dimension_semantics=("parallel",),   # megacore split on v7x
        ),
        cost_estimate=cost,
    )(x, w1, b1, w2, b2)

    # Slice off batch padding and the padded action lanes.
    return out[:B, :A]


def init_params(key, input_size, action_size=4, dtype=jnp.float32):
    """Deterministic PyTorch-style (uniform +-1/sqrt(fan_in)) Linear init."""
    k1, k2, k3, k4 = jax.random.split(key, 4)
    bound = 1.0 / jnp.sqrt(input_size)
    # Stored as [in, out] (transposed vs. PyTorch's [out, in]).
    w1 = jax.random.uniform(k1, (input_size, input_size), dtype, -bound, bound)
    b1 = jax.random.uniform(k2, (1, input_size), dtype, -bound, bound)
    w2 = jax.random.uniform(k3, (input_size, action_size), dtype, -bound, bound)
    b2 = jax.random.uniform(k4, (1, action_size), dtype, -bound, bound)
    return w1, b1, w2, b2


def reference_forward(x, w1, b1, w2, b2):
    h = jnp.maximum(x.astype(jnp.float32) @ w1.astype(jnp.float32)
                    + b1.astype(jnp.float32), 0.0)
    return h @ w2.astype(jnp.float32) + b2.astype(jnp.float32)


if __name__ == "__main__":
    INPUT_SIZE = 32    # Agent(input_size=32)
    ACTION_SIZE = 4    # fixed in the module

    key = jax.random.PRNGKey(0)
    kp, kx1, kx2 = jax.random.split(key, 3)
    w1, b1, w2, b2 = init_params(kp, INPUT_SIZE, ACTION_SIZE)

    fwd = jax.jit(agent_forward)

    # Module's replay batch (batch_size=10): tiny, latency-bound path.
    # TODO(synk): for the single-env choose_action path (B=1), epsilon-greedy
    # selection / argmax is host-side control flow; a plain XLA dot (or a fused
    # argmax epilogue) would avoid the extra op boundary — not done here.
    x_small = jax.random.normal(kx1, (10, INPUT_SIZE), jnp.float32)
    q_small = jax.block_until_ready(fwd(x_small, w1, b1, w2, b2))
    ref_small = reference_forward(x_small, w1, b1, w2, b2)
    assert q_small.shape == (10, ACTION_SIZE)
    assert jnp.allclose(q_small, ref_small, atol=1e-5, rtol=1e-5)

    # Awkward inference batch (300): pads only to 304 rows now, single tile on
    # v5e/v6e, two balanced parallel tiles on v7x.
    x_big = jax.random.normal(kx2, (300, INPUT_SIZE), jnp.float32)
    q_big = jax.block_until_ready(fwd(x_big, w1, b1, w2, b2))
    ref_big = reference_forward(x_big, w1, b1, w2, b2)
    assert q_big.shape == (300, ACTION_SIZE)
    assert jnp.allclose(q_big, ref_big, atol=1e-5, rtol=1e-5)

    # Force a multi-tile grid to exercise the streaming / pipelined path too.
    fwd_tiled = jax.jit(functools.partial(agent_forward, max_block_b=128))
    q_tiled = jax.block_until_ready(fwd_tiled(x_big, w1, b1, w2, b2))
    assert jnp.allclose(q_tiled, ref_big, atol=1e-5, rtol=1e-5)

    # TODO(synk): replay buffers, epsilon-greedy exploration, Adam updates,
    # MSE loss/backward and soft target-model updates are host-side training
    # loop control flow, not tensor compute, so no standalone Pallas kernel.
    print("KERNEL_OK")
</pallas_src>

<mosaic_0001>
module attributes {stable_mosaic.version = 11 : i64} {
  func.func @agent_mlp_kernel(%arg0: i32, %arg1: memref<16x32xf32, #tpu.memory_space<vmem>>, %arg2: memref<32x32xf32, #tpu.memory_space<vmem>>, %arg3: memref<1x32xf32, #tpu.memory_space<vmem>>, %arg4: memref<32x128xf32, #tpu.memory_space<vmem>>, %arg5: memref<1x128xf32, #tpu.memory_space<vmem>>, %arg6: memref<16x128xf32, #tpu.memory_space<vmem>>) attributes {dimension_semantics = [#tpu.dimension_semantics<parallel>], iteration_bounds = array<i64: 1>, scalar_prefetch = 0 : i64, scratch_operands = 0 : i64, tpu.core_type = #tpu.core_type<tc>, window_params = [{transform_indices = @transform_0, window_bounds = array<i64: 16, 32>}, {pipeline_mode = #tpu.pipeline_mode<synchronous>, transform_indices = @transform_1, window_bounds = array<i64: 32, 32>}, {pipeline_mode = #tpu.pipeline_mode<synchronous>, transform_indices = @transform_2, window_bounds = array<i64: 1, 32>}, {pipeline_mode = #tpu.pipeline_mode<synchronous>, transform_indices = @transform_3, window_bounds = array<i64: 32, 128>}, {pipeline_mode = #tpu.pipeline_mode<synchronous>, transform_indices = @transform_4, window_bounds = array<i64: 1, 128>}, {transform_indices = @transform_5, window_bounds = array<i64: 16, 128>}]} {
    %c0 = arith.constant 0 : index
    %c0_0 = arith.constant 0 : index
    %0 = vector.load %arg1[%c0, %c0_0] : memref<16x32xf32, #tpu.memory_space<vmem>>, vector<16x32xf32>
    %c0_1 = arith.constant 0 : index
    %c0_2 = arith.constant 0 : index
    %1 = vector.load %arg2[%c0_1, %c0_2] : memref<32x32xf32, #tpu.memory_space<vmem>>, vector<32x32xf32>
    %cst = arith.constant dense<0.000000e+00> : vector<16x32xf32>
    %2 = tpu.matmul %0, %1, %cst {dimension_numbers = #tpu.dot_dimension_numbers<[1], [0], [0], [1], [0, 0, 1, 1], [], []>} : vector<16x32xf32>, vector<32x32xf32>, vector<16x32xf32> -> vector<16x32xf32>
    %c0_3 = arith.constant 0 : index
    %c0_4 = arith.constant 0 : index
    %3 = vector.load %arg3[%c0_3, %c0_4] : memref<1x32xf32, #tpu.memory_space<vmem>>, vector<1x32xf32>
    %4 = vector.broadcast %3 : vector<1x32xf32> to vector<16x32xf32>
    %5 = arith.addf %2, %4 : vector<16x32xf32>
    %cst_5 = arith.constant 0.000000e+00 : f32
    %6 = vector.broadcast %cst_5 : f32 to vector<16x32xf32>
    %7 = arith.maximumf %5, %6 : vector<16x32xf32>
    %c0_6 = arith.constant 0 : index
    %c0_7 = arith.constant 0 : index
    %8 = vector.load %arg4[%c0_6, %c0_7] : memref<32x128xf32, #tpu.memory_space<vmem>>, vector<32x128xf32>
    %cst_8 = arith.constant dense<0.000000e+00> : vector<16x128xf32>
    %9 = tpu.matmul %7, %8, %cst_8 {dimension_numbers = #tpu.dot_dimension_numbers<[1], [0], [0], [1], [0, 0, 1, 1], [], []>} : vector<16x32xf32>, vector<32x128xf32>, vector<16x128xf32> -> vector<16x128xf32>
    %c0_9 = arith.constant 0 : index
    %c0_10 = arith.constant 0 : index
    %10 = vector.load %arg5[%c0_9, %c0_10] : memref<1x128xf32, #tpu.memory_space<vmem>>, vector<1x128xf32>
    %11 = vector.broadcast %10 : vector<1x128xf32> to vector<16x128xf32>
    %12 = arith.addf %9, %11 : vector<16x128xf32>
    %c0_11 = arith.constant 0 : index
    %c0_12 = arith.constant 0 : index
    %13 = vector.load %arg6[%c0_11, %c0_12] : memref<16x128xf32, #tpu.memory_space<vmem>>, vector<16x128xf32>
    tpu.vector_store %arg6[%c0_11, %c0_12], %12 {strides = array<i32>} : memref<16x128xf32, #tpu.memory_space<vmem>>, vector<16x128xf32>,
    return
  }
  func.func @transform_0(%arg0: i32) -> (i32, i32) {
    %c0_i32 = arith.constant 0 : i32
    %c0_i32_0 = arith.constant 0 : i32
    return %arg0, %c0_i32 : i32, i32
  }
  func.func @transform_1(%arg0: i32) -> (i32, i32) {
    %c0_i32 = arith.constant 0 : i32
    %c0_i32_0 = arith.constant 0 : i32
    %c0_i32_1 = arith.constant 0 : i32
    return %c0_i32, %c0_i32_0 : i32, i32
  }
  func.func @transform_2(%arg0: i32) -> (i32, i32) {
    %c0_i32 = arith.constant 0 : i32
    %c0_i32_0 = arith.constant 0 : i32
    %c0_i32_1 = arith.constant 0 : i32
    return %c0_i32, %c0_i32_0 : i32, i32
  }
  func.func @transform_3(%arg0: i32) -> (i32, i32) {
    %c0_i32 = arith.constant 0 : i32
    %c0_i32_0 = arith.constant 0 : i32
    %c0_i32_1 = arith.constant 0 : i32
    return %c0_i32, %c0_i32_0 : i32, i32
  }
  func.func @transform_4(%arg0: i32) -> (i32, i32) {
    %c0_i32 = arith.constant 0 : i32
    %c0_i32_0 = arith.constant 0 : i32
    %c0_i32_1 = arith.constant 0 : i32
    return %c0_i32, %c0_i32_0 : i32, i32
  }
  func.func @transform_5(%arg0: i32) -> (i32, i32) {
    %c0_i32 = arith.constant 0 : i32
    %c0_i32_0 = arith.constant 0 : i32
    return %arg0, %c0_i32 : i32, i32
  }
}

</mosaic_0001>

<bundles_post_ra>
// kernel: agent_forward.1
= control target key start
LH: loop header
LB: loop body
LE: loop exit
PB: predicated region body
PF: predicated region fallthrough
CT: control target
= control target key end

     0   :  { %vm33_vm0 = vcmask 261120   ;;  %s331_s1 = inlined_call_operand.vmem [shape: f32[32,32], index: 1, kind: input, shape index: {}]   ;;  %s332_s0 = inlined_call_operand.vmem [shape: f32[16,32], index: 0, kind: input, shape index: {}]   ;;  %s333_s3 = inlined_call_operand.vmem [shape: f32[32,128], index: 3, kind: input, shape index: {}]   ;;  %s334_s2 = inlined_call_operand.vmem [shape: f32[1,32], index: 2, kind: input, shape index: {}]   ;;  %s335_s4 = inlined_call_operand.vmem [shape: f32[1,128], index: 4, kind: input, shape index: {}]   ;;  %s336_s5 = inlined_call_operand.vmem [shape: f32[16,128], index: 5, kind: output, shape index: {}]  }
   0x1   :  { %v25_v0 = vld [vmem:[%s331_s1 + $0x18] sm:$0xff]  ;;  %v24_v1 = vld [vmem:[%s331_s1 + $0x10] sm:$0xff]  ;;  %v20_v2 = vld [vmem:[%s332_s0] sm:$0xff] }
   0x2   :  { %233 = vmatprep.subr.mxu0 %v25_v0  ;;  %v23_v3 = vld [vmem:[%s331_s1 + $0x8] sm:$0xff]  ;;  %241 = vmatprep.mubr.msk.f32.mxu0 %vm33_vm0, %v20_v2  ;;  %v22_v4 = vld [vmem:[%s331_s1] sm:$0xff]  ;;  %v120_v6 = vld [vmem:[%s333_s3 + $0x18] sm:$0xff] }
   0x3   :  { %234 = vmatpush3.msra.mxu0 %v25_v0  ;;  %v21_v5 = vld [vmem:[%s332_s0 + $0x8] sm:$0xff]  ;;  %244 = vmatprep.subr.mxu1 %v120_v6  ;;  %v119_v7 = vld [vmem:[%s333_s3 + $0x10] sm:$0xff]  ;;  %v117_v9 = vld [vmem:[%s333_s3] sm:$0xff] }
   0x4   :  { %235 = vmatprep.subr.mxu0 %v24_v1  ;;  %245 = vmatpush3.msra.mxu1 %v120_v6  ;;  %v118_v8 = vld [vmem:[%s333_s3 + $0x8] sm:$0xff]  ;;  %v215_v10 = vld [vmem:[%s334_s2] ss:$0 sm:$0xff] }
   0x5   :  { %236 = vmatpush3.msra.mxu0 %v24_v1  ;;  %246 = vmatprep.subr.mxu1 %v119_v7  ;;  %v218_v17 = vld [vmem:[%s335_s4] ss:$0 sm:$0xff] }
   0x6   :  { %237 = vmatprep.subr.mxu0 %v23_v3  ;;  %247 = vmatpush3.msra.mxu1 %v119_v7 }
   0x7   :  { %238 = vmatpush3.msra.mxu0 %v23_v3  ;;  %248 = vmatprep.subr.mxu1 %v118_v8 }
   0x8   :  { %239 = vmatprep.subr.mxu0 %v22_v4  ;;  %249 = vmatpush3.msra.mxu1 %v118_v8 }
   0x9   :  { %240 = vmatpush3.msra.mxu0 %v22_v4  ;;  %250 = vmatprep.subr.mxu1 %v117_v9 }
   0xa   :  { %242 = vmatmul.mubr.msk.f32.vlgmr.msra.gmra.mxu0 %vm33_vm0, %v21_v5  ;;  %251 = vmatpush3.msra.mxu1 %v117_v9 }
  0xca   :  { %v243_v11 = vpop.f32.mrf.mxu0 }
  0xcb   :  { %v112_v12 = vadd.f32 %v243_v11, %v215_v10 }
  0xcc   :  { %v106_v13 = vpop.f32.mrf.mxu0 }
  0xcd   :  { %v107_v14 = vadd.f32 %v215_v10, %v106_v13  ;;  %v116_v16 = vmax.f32 %v112_v12, 0.0 }
  0xcf   :  { %v115_v15 = vmax.f32 %v107_v14, 0.0 }
  0xd1   :  { %252 = vmatprep.mubr.msk.f32.mxu1 %vm33_vm0, %v115_v15 }
  0xd2   :  { %253 = vmatmul.mubr.msk.f32.vlgmr.msra.gmra.mxu1 %vm33_vm0, %v116_v16 }
 0x192   :  { %v254_v18 = vpop.f32.mrf.mxu1 }
 0x193   :  { %v206_v19 = vadd.f32 %v254_v18, %v218_v17 }
 0x194   :  { %v200_v20 = vpop.f32.mrf.mxu1 }
 0x195   :  { %210 = vst [vmem:[%s336_s5 + $0x8] sm:$0xff] %v206_v19  ;;  %v201_v21 = vadd.f32 %v218_v17, %v200_v20 }
 0x197   :  { %209 = vst [vmem:[%s336_s5] sm:$0xff] %v201_v21 }

</bundles_post_ra>
